<compile_context>
chip_gen: v6e
topology: v6e:2x2x1
jax: 0.10.0
libtpu: 0.0.40
codegen_flags: <defaults>
</compile_context>

<pallas_src>
import jax
import jax.numpy as jnp
from jax.experimental import pallas as pl
from jax.experimental.pallas import tpu as pltpu

BN_EPS = 1e-5
HID, HID_PAD = 64, 128   # hidden features, padded to a full lane group
OUT = 8                  # output lanes (real output is column 0); 8 = f32 sublane pack


def _round_up(n, m):
    return (n + m - 1) // m * m


def _mlp_kernel(x_ref, w1_ref, b1_ref, w2_ref, b2_ref, w3_ref, b3_ref, o_ref):
    """Fused 3-matmul MLP on one (TILE_B, 1024) batch tile.

    BatchNorms are pre-folded into w2/b2 and w3/b3; Dropout is identity (eval).
    x arrives in its native f32 and is cast to bf16 here (hidden under the DMA);
    matmuls run in bf16 on the MXU with f32 accumulation; bias+ReLU epilogues
    stay in f32.
    """
    x = x_ref[...].astype(jnp.bfloat16)                              # (TB, 1024) bf16

    # layer_1 + bias + ReLU
    h = jnp.dot(x, w1_ref[...], preferred_element_type=jnp.float32)  # (TB, 128) f32
    h = jnp.maximum(h + b1_ref[...], 0.0)

    # layer_2 (BN1 folded in) + bias + ReLU
    h = jnp.dot(h.astype(w2_ref.dtype), w2_ref[...],
                preferred_element_type=jnp.float32)                  # (TB, 128) f32
    h = jnp.maximum(h + b2_ref[...], 0.0)

    # dropout(p=0.1): identity in eval mode
    # layer_out (BN2 folded in); output kept at 8 lanes (column 0 is the logit)
    out = jnp.dot(h.astype(w3_ref.dtype), w3_ref[...],
                  preferred_element_type=jnp.float32)                # (TB, 8) f32
    o_ref[...] = out + b3_ref[...]


def prepare_params(params):
    """One-time prep: fold eval-mode BatchNorms into the following Linears,
    zero-pad hidden 64->128 / output 1->8 lanes, cast weights to bf16."""
    f32, bf16 = jnp.float32, jnp.bfloat16

    s1 = params["gamma1"] * jax.lax.rsqrt(params["var1"] + BN_EPS)
    t1 = params["beta1"] - params["mean1"] * s1
    s2 = params["gamma2"] * jax.lax.rsqrt(params["var2"] + BN_EPS)
    t2 = params["beta2"] - params["mean2"] * s2

    w1 = params["w1"].T                                  # (1024, 64)
    b1 = params["b1"]                                    # (64,)
    w2 = params["w2"].T * s1[:, None]                    # (64, 64)  BN1 scale on input side
    b2 = params["b2"] + params["w2"] @ t1                # (64,)
    w3 = params["w3"].T * s2[:, None]                    # (64, 1)   BN2 scale on input side
    b3 = params["b3"] + params["w3"] @ t2                # (1,)

    D = w1.shape[0]
    w1p = jnp.zeros((D, HID_PAD), f32).at[:, :HID].set(w1).astype(bf16)
    b1p = jnp.zeros((1, HID_PAD), f32).at[0, :HID].set(b1)
    w2p = jnp.zeros((HID_PAD, HID_PAD), f32).at[:HID, :HID].set(w2).astype(bf16)
    b2p = jnp.zeros((1, HID_PAD), f32).at[0, :HID].set(b2)
    w3p = jnp.zeros((HID_PAD, OUT), f32).at[:HID, :1].set(w3).astype(bf16)
    b3p = jnp.zeros((1, OUT), f32).at[0, :1].set(b3)
    return (w1p, b1p, w2p, b2p, w3p, b3p)


def binary_classification_forward(x, prepared, *, tile_b=2048):
    """x: (B, 1024) float32.  prepared: output of prepare_params(). Returns (B, 1) f32."""
    B, D = x.shape
    w1p, b1p, w2p, b2p, w3p, b3p = prepared

    # Tile choice: big enough to amortize per-step overhead, capped so it fits
    # VMEM on v7x (64 MiB physical), and clamped so large batches always split
    # into >= 2 "parallel" tiles (keeps both v7x TensorCores busy).
    tb = min(tile_b, max(8, _round_up(pl.cdiv(B, 2), 8)))
    n_tiles = pl.cdiv(B, tb)

    # Explicit VMEM budget (v5e default scoped limit is only 16 MiB).
    vmem_bytes = (
        2 * tb * D * x.dtype.itemsize            # x tile, double-buffered
        + 2 * tb * OUT * 4                       # output tile, double-buffered
        + 2 * (w1p.size + w2p.size + w3p.size) * 2   # bf16 weights, double-buffered
        + 2 * (b1p.size + b2p.size + b3p.size) * 4   # f32 biases
        + (2 << 20)                              # compiler scratch headroom
    )
    vmem_limit = int(min(max(vmem_bytes, 32 << 20), 56 << 20))

    const = lambda i: (0, 0)                     # weights stay VMEM-resident across tiles
    out = pl.pallas_call(
        _mlp_kernel,
        out_shape=jax.ShapeDtypeStruct((B, OUT), jnp.float32),
        grid=(n_tiles,),
        in_specs=[
            pl.BlockSpec((tb, D), lambda i: (i, 0)),       # x tile (pipelined, partial last tile OK)
            pl.BlockSpec((D, HID_PAD), const),             # w1
            pl.BlockSpec((1, HID_PAD), const),             # b1
            pl.BlockSpec((HID_PAD, HID_PAD), const),       # w2 (BN1 folded)
            pl.BlockSpec((1, HID_PAD), const),             # b2
            pl.BlockSpec((HID_PAD, OUT), const),           # w3 (BN2 folded)
            pl.BlockSpec((1, OUT), const),                 # b3
        ],
        out_specs=pl.BlockSpec((tb, OUT), lambda i: (i, 0)),
        compiler_params=pltpu.CompilerParams(
            dimension_semantics=("parallel",),             # shard batch tiles across TCs (v7x)
            vmem_limit_bytes=vmem_limit,
        ),
    )(x, w1p, b1p, w2p, b2p, w3p, b3p)

    return out[:, :1]


def init_params(key):
    """Deterministic parameter init mimicking nn.Linear default (U[-1/sqrt(fan_in), ...])."""
    ks = jax.random.split(key, 6)

    def linear(kw, kb, fan_in, fan_out):
        bound = 1.0 / jnp.sqrt(fan_in)
        w = jax.random.uniform(kw, (fan_out, fan_in), jnp.float32, -bound, bound)
        b = jax.random.uniform(kb, (fan_out,), jnp.float32, -bound, bound)
        return w, b

    w1, b1 = linear(ks[0], ks[1], 1024, 64)
    w2, b2 = linear(ks[2], ks[3], 64, 64)
    w3, b3 = linear(ks[4], ks[5], 64, 1)

    return {
        "w1": w1, "b1": b1,
        "w2": w2, "b2": b2,
        "w3": w3, "b3": b3,
        # BatchNorm1d(64) defaults: gamma=1, beta=0, running_mean=0, running_var=1
        "gamma1": jnp.ones((64,), jnp.float32), "beta1": jnp.zeros((64,), jnp.float32),
        "mean1": jnp.zeros((64,), jnp.float32), "var1": jnp.ones((64,), jnp.float32),
        "gamma2": jnp.ones((64,), jnp.float32), "beta2": jnp.zeros((64,), jnp.float32),
        "mean2": jnp.zeros((64,), jnp.float32), "var2": jnp.ones((64,), jnp.float32),
    }


def _reference_forward(x, params):
    """Pure-JAX f32 reference (eval-mode BN, identity dropout)."""
    h = jnp.maximum(x @ params["w1"].T + params["b1"], 0.0)
    h = (h - params["mean1"]) / jnp.sqrt(params["var1"] + BN_EPS) * params["gamma1"] + params["beta1"]
    h = jnp.maximum(h @ params["w2"].T + params["b2"], 0.0)
    h = (h - params["mean2"]) / jnp.sqrt(params["var2"] + BN_EPS) * params["gamma2"] + params["beta2"]
    return h @ params["w3"].T + params["b3"]


if __name__ == "__main__":
    key = jax.random.PRNGKey(0)
    k_param, k_x = jax.random.split(key)

    params = init_params(k_param)
    x = jax.random.normal(k_x, (8, 1024), jnp.float32)   # batch=8, in_features=1024

    prepared = prepare_params(params)                     # one-time weight prep (off hot path)
    out = binary_classification_forward(x, prepared)
    out = jax.block_until_ready(out)

    ref = _reference_forward(x, params)
    assert out.shape == (8, 1)
    # bf16 inputs/weights with f32 accumulation: ~0.5-1% relative error budget
    assert jnp.allclose(out, ref, atol=3e-2, rtol=3e-2), "mismatch vs reference"

    print("KERNEL_OK")
</pallas_src>

<mosaic_0001>
module attributes {stable_mosaic.version = 11 : i64} {
  func.func @_mlp_kernel(%arg0: i32, %arg1: memref<8x1024xf32, #tpu.memory_space<vmem>>, %arg2: memref<1024x128xbf16, #tpu.memory_space<vmem>>, %arg3: memref<1x128xf32, #tpu.memory_space<vmem>>, %arg4: memref<128x128xbf16, #tpu.memory_space<vmem>>, %arg5: memref<1x128xf32, #tpu.memory_space<vmem>>, %arg6: memref<128x8xbf16, #tpu.memory_space<vmem>>, %arg7: memref<1x8xf32, #tpu.memory_space<vmem>>, %arg8: memref<8x8xf32, #tpu.memory_space<vmem>>) attributes {dimension_semantics = [#tpu.dimension_semantics<parallel>], iteration_bounds = array<i64: 1>, scalar_prefetch = 0 : i64, scratch_operands = 0 : i64, tpu.core_type = #tpu.core_type<tc>, window_params = [{transform_indices = @transform_0, window_bounds = array<i64: 8, 1024>}, {pipeline_mode = #tpu.pipeline_mode<synchronous>, transform_indices = @transform_1, window_bounds = array<i64: 1024, 128>}, {pipeline_mode = #tpu.pipeline_mode<synchronous>, transform_indices = @transform_2, window_bounds = array<i64: 1, 128>}, {pipeline_mode = #tpu.pipeline_mode<synchronous>, transform_indices = @transform_3, window_bounds = array<i64: 128, 128>}, {pipeline_mode = #tpu.pipeline_mode<synchronous>, transform_indices = @transform_4, window_bounds = array<i64: 1, 128>}, {pipeline_mode = #tpu.pipeline_mode<synchronous>, transform_indices = @transform_5, window_bounds = array<i64: 128, 8>}, {pipeline_mode = #tpu.pipeline_mode<synchronous>, transform_indices = @transform_6, window_bounds = array<i64: 1, 8>}, {transform_indices = @transform_7, window_bounds = array<i64: 8, 8>}]} {
    %c0 = arith.constant 0 : index
    %c0_0 = arith.constant 0 : index
    %0 = vector.load %arg1[%c0, %c0_0] : memref<8x1024xf32, #tpu.memory_space<vmem>>, vector<8x1024xf32>
    %1 = arith.truncf %0 : vector<8x1024xf32> to vector<8x1024xbf16>
    %c0_1 = arith.constant 0 : index
    %c0_2 = arith.constant 0 : index
    %2 = vector.load %arg2[%c0_1, %c0_2] : memref<1024x128xbf16, #tpu.memory_space<vmem>>, vector<1024x128xbf16>
    %cst = arith.constant dense<0.000000e+00> : vector<8x128xf32>
    %3 = tpu.matmul %1, %2, %cst {dimension_numbers = #tpu.dot_dimension_numbers<[1], [0], [0], [1], [0, 0, 1, 1], [], []>} : vector<8x1024xbf16>, vector<1024x128xbf16>, vector<8x128xf32> -> vector<8x128xf32>
    %c0_3 = arith.constant 0 : index
    %c0_4 = arith.constant 0 : index
    %4 = vector.load %arg3[%c0_3, %c0_4] : memref<1x128xf32, #tpu.memory_space<vmem>>, vector<1x128xf32>
    %5 = vector.broadcast %4 : vector<1x128xf32> to vector<8x128xf32>
    %6 = arith.addf %3, %5 : vector<8x128xf32>
    %cst_5 = arith.constant 0.000000e+00 : f32
    %7 = vector.broadcast %cst_5 : f32 to vector<8x128xf32>
    %8 = arith.maximumf %6, %7 : vector<8x128xf32>
    %9 = arith.truncf %8 : vector<8x128xf32> to vector<8x128xbf16>
    %c0_6 = arith.constant 0 : index
    %c0_7 = arith.constant 0 : index
    %10 = vector.load %arg4[%c0_6, %c0_7] : memref<128x128xbf16, #tpu.memory_space<vmem>>, vector<128x128xbf16>
    %cst_8 = arith.constant dense<0.000000e+00> : vector<8x128xf32>
    %11 = tpu.matmul %9, %10, %cst_8 {dimension_numbers = #tpu.dot_dimension_numbers<[1], [0], [0], [1], [0, 0, 1, 1], [], []>} : vector<8x128xbf16>, vector<128x128xbf16>, vector<8x128xf32> -> vector<8x128xf32>
    %c0_9 = arith.constant 0 : index
    %c0_10 = arith.constant 0 : index
    %12 = vector.load %arg5[%c0_9, %c0_10] : memref<1x128xf32, #tpu.memory_space<vmem>>, vector<1x128xf32>
    %13 = vector.broadcast %12 : vector<1x128xf32> to vector<8x128xf32>
    %14 = arith.addf %11, %13 : vector<8x128xf32>
    %cst_11 = arith.constant 0.000000e+00 : f32
    %15 = vector.broadcast %cst_11 : f32 to vector<8x128xf32>
    %16 = arith.maximumf %14, %15 : vector<8x128xf32>
    %17 = arith.truncf %16 : vector<8x128xf32> to vector<8x128xbf16>
    %c0_12 = arith.constant 0 : index
    %c0_13 = arith.constant 0 : index
    %18 = vector.load %arg6[%c0_12, %c0_13] : memref<128x8xbf16, #tpu.memory_space<vmem>>, vector<128x8xbf16>
    %cst_14 = arith.constant dense<0.000000e+00> : vector<8x8xf32>
    %19 = tpu.matmul %17, %18, %cst_14 {dimension_numbers = #tpu.dot_dimension_numbers<[1], [0], [0], [1], [0, 0, 1, 1], [], []>} : vector<8x128xbf16>, vector<128x8xbf16>, vector<8x8xf32> -> vector<8x8xf32>
    %c0_15 = arith.constant 0 : index
    %c0_16 = arith.constant 0 : index
    %20 = vector.load %arg7[%c0_15, %c0_16] : memref<1x8xf32, #tpu.memory_space<vmem>>, vector<1x8xf32>
    %21 = vector.broadcast %20 : vector<1x8xf32> to vector<8x8xf32>
    %22 = arith.addf %19, %21 : vector<8x8xf32>
    %c0_17 = arith.constant 0 : index
    %c0_18 = arith.constant 0 : index
    %23 = vector.load %arg8[%c0_17, %c0_18] : memref<8x8xf32, #tpu.memory_space<vmem>>, vector<8x8xf32>
    tpu.vector_store %arg8[%c0_17, %c0_18], %22 {strides = array<i32>} : memref<8x8xf32, #tpu.memory_space<vmem>>, vector<8x8xf32>,
    return
  }
  func.func @transform_0(%arg0: i32) -> (i32, i32) {
    %c0_i32 = arith.constant 0 : i32
    %c0_i32_0 = arith.constant 0 : i32
    return %arg0, %c0_i32 : i32, i32
  }
  func.func @transform_1(%arg0: i32) -> (i32, i32) {
    %c0_i32 = arith.constant 0 : i32
    %c0_i32_0 = arith.constant 0 : i32
    %c0_i32_1 = arith.constant 0 : i32
    return %c0_i32, %c0_i32_0 : i32, i32
  }
  func.func @transform_2(%arg0: i32) -> (i32, i32) {
    %c0_i32 = arith.constant 0 : i32
    %c0_i32_0 = arith.constant 0 : i32
    %c0_i32_1 = arith.constant 0 : i32
    return %c0_i32, %c0_i32_0 : i32, i32
  }
  func.func @transform_3(%arg0: i32) -> (i32, i32) {
    %c0_i32 = arith.constant 0 : i32
    %c0_i32_0 = arith.constant 0 : i32
    %c0_i32_1 = arith.constant 0 : i32
    return %c0_i32, %c0_i32_0 : i32, i32
  }
  func.func @transform_4(%arg0: i32) -> (i32, i32) {
    %c0_i32 = arith.constant 0 : i32
    %c0_i32_0 = arith.constant 0 : i32
    %c0_i32_1 = arith.constant 0 : i32
    return %c0_i32, %c0_i32_0 : i32, i32
  }
  func.func @transform_5(%arg0: i32) -> (i32, i32) {
    %c0_i32 = arith.constant 0 : i32
    %c0_i32_0 = arith.constant 0 : i32
    %c0_i32_1 = arith.constant 0 : i32
    return %c0_i32, %c0_i32_0 : i32, i32
  }
  func.func @transform_6(%arg0: i32) -> (i32, i32) {
    %c0_i32 = arith.constant 0 : i32
    %c0_i32_0 = arith.constant 0 : i32
    %c0_i32_1 = arith.constant 0 : i32
    return %c0_i32, %c0_i32_0 : i32, i32
  }
  func.func @transform_7(%arg0: i32) -> (i32, i32) {
    %c0_i32 = arith.constant 0 : i32
    %c0_i32_0 = arith.constant 0 : i32
    return %arg0, %c0_i32 : i32, i32
  }
}

</mosaic_0001>

<bundles_post_ra>
// kernel: tpu_custom_call.1
= control target key start
LH: loop header
LB: loop body
LE: loop exit
PB: predicated region body
PF: predicated region fallthrough
CT: control target
= control target key end

     0   :  { %12 = vsyncpa [#allocation3], 0  ;;  %s1508_s0 = inlined_call_operand.vmem [shape: f32[8,1024], index: 0, kind: input, shape index: {}]   ;;  %s1509_s1 = inlined_call_operand.hbm [shape: bf16[1024,128], index: 1, kind: input, shape index: {}]   ;;  %s1510_s2 = inlined_call_operand.vmem [shape: f32[1,128], index: 2, kind: input, shape index: {}]   ;;  %s1511_s3 = inlined_call_operand.hbm [shape: bf16[128,128], index: 3, kind: input, shape index: {}]   ;;  %s1512_s4 = inlined_call_operand.vmem [shape: f32[1,128], index: 4, kind: input, shape index: {}]   ;;  %s1513_s5 = inlined_call_operand.vmem [shape: bf16[128,8], index: 5, kind: input, shape index: {}]   ;;  %s1514_s6 = inlined_call_operand.vmem [shape: f32[1,8], index: 6, kind: input, shape index: {}]   ;;  %s1515_s7 = inlined_call_operand.hbm [shape: f32[8,8], index: 7, kind: output, shape index: {}]  }
   0x1   :  { %13 = vsyncpa [#allocation6], 0 }
   0x2   :  { %14 = vsyncpa [#allocation4], 0  ;;  %s1377_s24 = smov [#allocation2]  }
   0x3   :  { %s22_s25 = sshll.u32 %s1377_s24, 4  ;;  %s23_s25 = int_to_ptr.vmem [resolvable:$true] %s22_s25 }
   0x4   :  { %s1319_s26 = scalar_lea.vmem %s23_s25, 8192  ;;  %p1324_p1 = scmp.lt.s32.totalorder %s23_s25, %s23_s25 }
   0x5   :  { %p1320_p0 = scmp.ne.s32.totalorder %s23_s25, %s1319_s26  ;;  %p1325_p2 = scmp.lt.s32.totalorder %s1319_s26, %s1319_s26 }
   0x7   :  { %p1326_p3 = por %p1325_p2, %p1324_p1 }
   0x9   :  { %p1327_p4 = pnand %p1326_p3, %p1320_p0 }
   0xb   :  { %1330 = shalt.err (!%p1327_p4)
}
   0xc   :  { %s1378_s27 = smov 64   ;;  %s1379_s28 = smov 4  }
   0xd   :  { %28 = dma.hbm_to_vmem [thread:$0]  %s1509_s1, 8192, %s23_s25, [#allocation3], %s1378_s27, %s1378_s27, %s1379_s28  }
   0xe   :  { %s1380_s8 = smov [#allocation5]  }
   0xf   :  { %s36_s9 = sshll.u32 %s1380_s8, 4  ;;  %s37_s9 = int_to_ptr.vmem [resolvable:$true] %s36_s9 }
  0x10   :  { %s1339_s10 = scalar_lea.vmem %s37_s9, 1024  ;;  %p1344_p6 = scmp.lt.s32.totalorder %s37_s9, %s37_s9 }
  0x11   :  { %p1340_p5 = scmp.ne.s32.totalorder %s37_s9, %s1339_s10  ;;  %p1345_p7 = scmp.lt.s32.totalorder %s1339_s10, %s1339_s10 }
  0x13   :  { %p1346_p8 = por %p1345_p7, %p1344_p6 }
  0x15   :  { %p1347_p9 = pnand %p1346_p8, %p1340_p5 }
  0x17   :  { %1350 = shalt.err (!%p1347_p9)
}
  0x18   :  { %42 = dma.hbm_to_vmem [thread:$0]  %s1511_s3, 1024, %s37_s9, [#allocation6], %s1378_s27, %s1378_s27, %s1379_s28  }
  0x19   :  { %1371 = dma.done.wait [#allocation3], 8192  }
  0x1a   :  { %1372 = vsyncadd [#allocation3], 4294959104 }
  0x1b   :  { %1373 = dma.done.wait [#allocation6], 1024  }
  0x1c   :  { %1374 = vsyncadd [#allocation6], 4294966272  ;;  %v1231_v0 = vld [vmem:[#allocation2 + $0x78] sm:$0xff]   ;;  %v1235_v4 = vld [vmem:[#allocation2 + $0x70] sm:$0xff]   ;;  %vm1382_vm0 = vmmov 0   ;;  %s1383_s22 = smov [#allocation7]  }
  0x1d   :  { %v1232_v1 = vld [vmem:[#allocation2 + $0xf8] sm:$0xff]   ;;  %1078 = vmatprep.subr.bf16.mxu0 %v1231_v0  ;;  %v1236_v5 = vld [vmem:[#allocation2 + $0xf0] sm:$0xff]   ;;  %v1239_v8 = vld [vmem:[#allocation2 + $0x68] sm:$0xff]   ;;  %s985_s23 = sshll.u32 %s1383_s22, 4  ;;  %vm977_vm1 = vcmask 64512   ;;  %s986_s23 = int_to_ptr.vmem [resolvable:$true] %s985_s23 }
  0x1e   :  { %v1233_v2 = vld [vmem:[#allocation2 + $0x38] sm:$0xff]   ;;  %1100 = vmatprep.subr.bf16.mxu1 %v1232_v1  ;;  %v1237_v6 = vld [vmem:[#allocation2 + $0x30] sm:$0xff]   ;;  %v1240_v9 = vld [vmem:[#allocation2 + $0xe8] sm:$0xff]   ;;  %p1356_p11 = scmp.lt.s32.totalorder %s986_s23, %s986_s23 }
  0x1f   :  { %v1234_v3 = vld [vmem:[#allocation2 + $0xb8] sm:$0xff]   ;;  %1079 = vmatpush3.bf16.msra.mxu0 %v1233_v2  ;;  %v1238_v7 = vld [vmem:[#allocation2 + $0xb0] sm:$0xff]   ;;  %v1241_v10 = vld [vmem:[#allocation2 + $0x28] sm:$0xff]  }
  0x20   :  { %1101 = vmatpush3.bf16.msra.mxu1 %v1234_v3  ;;  %1080 = vmatprep.subr.bf16.mxu0 %v1235_v4  ;;  %v1242_v11 = vld [vmem:[#allocation2 + $0xa8] sm:$0xff]   ;;  %v1243_v12 = vld [vmem:[#allocation2 + $0x60] sm:$0xff]   ;;  %v1247_v16 = vld [vmem:[#allocation2 + $0x58] sm:$0xff]  }
  0x21   :  { %1102 = vmatprep.subr.bf16.mxu1 %v1236_v5  ;;  %v1244_v13 = vld [vmem:[#allocation2 + $0xe0] sm:$0xff]   ;;  %v1248_v17 = vld [vmem:[#allocation2 + $0xd8] sm:$0xff]   ;;  %v1251_v20 = vld [vmem:[#allocation2 + $0x50] sm:$0xff]  }
  0x22   :  { %v1245_v14 = vld [vmem:[#allocation2 + $0x20] sm:$0xff]   ;;  %v1249_v18 = vld [vmem:[#allocation2 + $0x18] sm:$0xff]   ;;  %v1252_v21 = vld [vmem:[#allocation2 + $0xd0] sm:$0xff]  }
  0x23   :  { %1081 = vmatpush3.bf16.msra.mxu0 %v1237_v6  ;;  %v1246_v15 = vld [vmem:[#allocation2 + $0xa0] sm:$0xff]   ;;  %v1250_v19 = vld [vmem:[#allocation2 + $0x98] sm:$0xff]   ;;  %v1253_v22 = vld [vmem:[#allocation2 + $0x10] sm:$0xff]  }
  0x24   :  { %1103 = vmatpush3.bf16.msra.mxu1 %v1238_v7  ;;  %1082 = vmatprep.subr.bf16.mxu0 %v1239_v8  ;;  %v1254_v23 = vld [vmem:[#allocation2 + $0x90] sm:$0xff]   ;;  %v1255_v24 = vld [vmem:[#allocation2 + $0x48] sm:$0xff]   ;;  %v1259_v28 = vld [vmem:[#allocation2 + $0x40] sm:$0xff]  }
  0x25   :  { %1104 = vmatprep.subr.bf16.mxu1 %v1240_v9  ;;  %v1256_v25 = vld [vmem:[#allocation2 + $0xc8] sm:$0xff]   ;;  %v1260_v29 = vld [vmem:[#allocation2 + $0xc0] sm:$0xff]   ;;  %v59_v33 = vld [vmem:[%s1508_s0 + $0x18] sm:$0xff] }
  0x26   :  { %v1257_v26 = vld [vmem:[#allocation2 + $0x8] sm:$0xff]   ;;  %v1261_v30 = vld [vmem:[#allocation2] sm:$0xff]   ;;  %v67_v36 = vpack.c.bf16 %v59_v33, %v59_v33  ;;  %v58_v38 = vld [vmem:[%s1508_s0 + $0x10] sm:$0xff] }
  0x27   :  { %1083 = vmatpush3.bf16.msra.mxu0 %v1241_v10  ;;  %v1258_v27 = vld [vmem:[#allocation2 + $0x88] sm:$0xff]   ;;  %v1262_v31 = vld [vmem:[#allocation2 + $0x80] sm:$0xff]   ;;  %v66_v39 = vpack.c.bf16 %v58_v38, %v58_v38  ;;  %v1263_v40 = vld [vmem:[#allocation2 + $0x178] sm:$0xff]  }
  0x28   :  { %1105 = vmatpush3.bf16.msra.mxu1 %v1242_v11  ;;  %1084 = vmatprep.subr.bf16.mxu0 %v1243_v12  ;;  %v57_v32 = vld [vmem:[%s1508_s0 + $0x8] sm:$0xff]  ;;  %v56_v34 = vld [vmem:[%s1508_s0] sm:$0xff]  ;;  %v1264_v41 = vld [vmem:[#allocation2 + $0x1f8] sm:$0xff]  }
  0x29   :  { %1106 = vmatprep.subr.bf16.mxu1 %v1244_v13  ;;  %v65_v35 = vpack.c.bf16 %v57_v32, %v57_v32  ;;  %v64_v37 = vpack.c.bf16 %v56_v34, %v56_v34  ;;  %663 = vmatprep.mubr.bf16.mxu1 %v67_v36  ;;  %v1265_v42 = vld [vmem:[#allocation2 + $0x138] sm:$0xff]   ;;  %v1267_v44 = vld [vmem:[#allocation2 + $0x170] sm:$0xff]   ;;  %v1271_v48 = vld [vmem:[#allocation2 + $0x168] sm:$0xff]  }
  0x2a   :  { %v1266_v43 = vld [vmem:[#allocation2 + $0x1b8] sm:$0xff]   ;;  %v1268_v45 = vld [vmem:[#allocation2 + $0x1f0] sm:$0xff]   ;;  %v1272_v49 = vld [vmem:[#allocation2 + $0x1e8] sm:$0xff]  }
  0x2b   :  { %1085 = vmatpush3.bf16.msra.mxu0 %v1245_v14  ;;  %623 = vmatprep.mubr.bf16.mxu0 %v65_v35  ;;  %v1269_v46 = vld [vmem:[#allocation2 + $0x130] sm:$0xff]   ;;  %v1273_v50 = vld [vmem:[#allocation2 + $0x128] sm:$0xff]   ;;  %v1275_v52 = vld [vmem:[#allocation2 + $0x160] sm:$0xff]  }
  0x2c   :  { %1107 = vmatpush3.bf16.msra.mxu1 %v1246_v15  ;;  %1086 = vmatprep.subr.bf16.mxu0 %v1247_v16  ;;  %v1270_v47 = vld [vmem:[#allocation2 + $0x1b0] sm:$0xff]   ;;  %v1274_v51 = vld [vmem:[#allocation2 + $0x1a8] sm:$0xff]   ;;  %v1276_v53 = vld [vmem:[#allocation2 + $0x1e0] sm:$0xff]  }
  0x2d   :  { %1108 = vmatprep.subr.bf16.mxu1 %v1248_v17  ;;  %v1277_v54 = vld [vmem:[#allocation2 + $0x120] sm:$0xff]   ;;  %v1279_v56 = vld [vmem:[#allocation2 + $0x158] sm:$0xff]   ;;  %v1283_v60 = vld [vmem:[#allocation2 + $0x150] sm:$0xff]   ;;  %v1381_v17 = vmov 0.0  }
  0x2e   :  { %v1278_v55 = vld [vmem:[#allocation2 + $0x1a0] sm:$0xff]   ;;  %v1280_v57 = vld [vmem:[#allocation2 + $0x1d8] sm:$0xff]   ;;  %v1284_v61 = vld [vmem:[#allocation2 + $0x1d0] sm:$0xff]  }
  0x2f   :  { %1087 = vmatpush3.bf16.msra.mxu0 %v1249_v18  ;;  %v1281_v58 = vld [vmem:[#allocation2 + $0x118] sm:$0xff]   ;;  %v1285_v62 = vld [vmem:[#allocation2 + $0x110] sm:$0xff]   ;;  %v1287_v0 = vld [vmem:[#allocation2 + $0x148] sm:$0xff]  }
  0x30   :  { %1109 = vmatpush3.bf16.msra.mxu1 %v1250_v19  ;;  %1088 = vmatprep.subr.bf16.mxu0 %v1251_v20  ;;  %v1282_v59 = vld [vmem:[#allocation2 + $0x198] sm:$0xff]   ;;  %v1286_v63 = vld [vmem:[#allocation2 + $0x190] sm:$0xff]   ;;  %v1288_v1 = vld [vmem:[#allocation2 + $0x1c8] sm:$0xff]  }
  0x31   :  { %1110 = vmatprep.subr.bf16.mxu1 %v1252_v21  ;;  %v1289_v2 = vld [vmem:[#allocation2 + $0x108] sm:$0xff]   ;;  %v1291_v4 = vld [vmem:[#allocation2 + $0x140] sm:$0xff]   ;;  %v63_v9 = vld [vmem:[%s1508_s0 + $0x38] sm:$0xff] }
  0x32   :  { %v1290_v3 = vld [vmem:[#allocation2 + $0x188] sm:$0xff]   ;;  %v1292_v5 = vld [vmem:[#allocation2 + $0x1c0] sm:$0xff]   ;;  %v71_v11 = vpack.c.bf16 %v63_v9, %v63_v9  ;;  %v62_v13 = vld [vmem:[%s1508_s0 + $0x30] sm:$0xff] }
  0x33   :  { %1089 = vmatpush3.bf16.msra.mxu0 %v1253_v22  ;;  %v1293_v6 = vld [vmem:[#allocation2 + $0x100] sm:$0xff]   ;;  %v61_v8 = vld [vmem:[%s1508_s0 + $0x28] sm:$0xff]  ;;  %v70_v15 = vpack.c.bf16 %v62_v13, %v62_v13  ;;  %v1295_v16 = vld [vmem:[#allocation5 + $0x38] sm:$0xff]  }
  0x34   :  { %1111 = vmatpush3.bf16.msra.mxu1 %v1254_v23  ;;  %1090 = vmatprep.subr.bf16.mxu0 %v1255_v24  ;;  %v1294_v7 = vld [vmem:[#allocation2 + $0x180] sm:$0xff]   ;;  %v69_v10 = vpack.c.bf16 %v61_v8, %v61_v8  ;;  %v1296_v18 = vld [vmem:[#allocation5 + $0x30] sm:$0xff]   ;;  %v1297_v19 = vld [vmem:[#allocation5 + $0x28] sm:$0xff]  }
  0x35   :  { %1112 = vmatprep.subr.bf16.mxu1 %v1256_v25  ;;  %v60_v12 = vld [vmem:[%s1508_s0 + $0x20] sm:$0xff]  ;;  %v1299_v21 = vld [vmem:[#allocation5 + $0x18] sm:$0xff]   ;;  %v1300_v22 = vld [vmem:[#allocation5 + $0x10] sm:$0xff]  }
  0x36   :  { %v68_v14 = vpack.c.bf16 %v60_v12, %v60_v12  ;;  %v1298_v20 = vld [vmem:[#allocation5 + $0x20] sm:$0xff]   ;;  %v1301_v23 = vld [vmem:[#allocation5 + $0x8] sm:$0xff]   ;;  %v1303_v25 = vld [vmem:[%s1513_s5 + $0x38] sm:$0xff]  }
  0x37   :  { %1091 = vmatpush3.bf16.msra.mxu0 %v1257_v26  ;;  %v1302_v24 = vld [vmem:[#allocation5] sm:$0xff]   ;;  %v1304_v26 = vld [vmem:[%s1513_s5 + $0x30] sm:$0xff]  }
  0x38   :  { %1113 = vmatpush3.bf16.msra.mxu1 %v1258_v27  ;;  %1092 = vmatprep.subr.bf16.mxu0 %v1259_v28  ;;  %v1305_v27 = vld [vmem:[%s1513_s5 + $0x28] sm:$0xff]   ;;  %v1306_v28 = vld [vmem:[%s1513_s5 + $0x20] sm:$0xff]  }
  0x39   :  { %1114 = vmatprep.subr.bf16.mxu1 %v1260_v29  ;;  %v1307_v29 = vld [vmem:[%s1513_s5 + $0x18] sm:$0xff]  }
  0x3b   :  { %1093 = vmatpush3.bf16.msra.mxu0 %v1261_v30  ;;  %v1308_v30 = vld [vmem:[%s1513_s5 + $0x10] sm:$0xff]  }
  0x3c   :  { %1115 = vmatpush3.bf16.msra.mxu1 %v1262_v31  ;;  %1122 = vmatprep.subr.bf16.mxu0 %v1263_v40  ;;  %v995_v40 = vld [vmem:[%s1510_s2] ss:$0 sm:$0xff] }
  0x3d   :  { %1144 = vmatprep.subr.bf16.mxu1 %v1264_v41 }
  0x3e   :  { %624 = vmatmul.mubr.bf16.vlgmr.msra.gmra.mxu0 %v64_v37 }
  0x3f   :  { %664 = vmatmul.mubr.bf16.vlgmr.msra.gmra.mxu1 %v66_v39  ;;  %1123 = vmatpush3.bf16.msra.mxu0 %v1265_v42 }
  0x40   :  { %1145 = vmatpush3.bf16.msra.mxu1 %v1266_v43  ;;  %1124 = vmatprep.subr.bf16.mxu0 %v1267_v44 }
  0x41   :  { %1146 = vmatprep.subr.bf16.mxu1 %v1268_v45  ;;  %703 = vmatprep.mubr.bf16.mxu0 %v69_v10 }
  0x42   :  { %743 = vmatprep.mubr.bf16.mxu1 %v71_v11 }
  0x43   :  { %1125 = vmatpush3.bf16.msra.mxu0 %v1269_v46 }
  0x44   :  { %1147 = vmatpush3.bf16.msra.mxu1 %v1270_v47  ;;  %1126 = vmatprep.subr.bf16.mxu0 %v1271_v48 }
  0x45   :  { %1148 = vmatprep.subr.bf16.mxu1 %v1272_v49 }
  0x47   :  { %1127 = vmatpush3.bf16.msra.mxu0 %v1273_v50 }
  0x48   :  { %1149 = vmatpush3.bf16.msra.mxu1 %v1274_v51  ;;  %1128 = vmatprep.subr.bf16.mxu0 %v1275_v52 }
  0x49   :  { %1150 = vmatprep.subr.bf16.mxu1 %v1276_v53 }
  0x4b   :  { %1129 = vmatpush3.bf16.msra.mxu0 %v1277_v54 }
  0x4c   :  { %1151 = vmatpush3.bf16.msra.mxu1 %v1278_v55  ;;  %1130 = vmatprep.subr.bf16.mxu0 %v1279_v56 }
  0x4d   :  { %1152 = vmatprep.subr.bf16.mxu1 %v1280_v57 }
  0x4f   :  { %1131 = vmatpush3.bf16.msra.mxu0 %v1281_v58  ;;  %v1309_v58 = vld [vmem:[%s1513_s5 + $0x8] sm:$0xff]  }
  0x50   :  { %1153 = vmatpush3.bf16.msra.mxu1 %v1282_v59  ;;  %1132 = vmatprep.subr.bf16.mxu0 %v1283_v60  ;;  %v1310_v59 = vld [vmem:[%s1513_s5] sm:$0xff]  }
  0x51   :  { %1154 = vmatprep.subr.bf16.mxu1 %v1284_v61  ;;  %v1060_v60 = vld [vmem:[%s1512_s4] ss:$0 sm:$0xff]  ;;  %s1351_s4 = scalar_lea.vmem %s986_s23, 128 }
  0x52   :  { %p1352_p10 = scmp.ne.s32.totalorder %s986_s23, %s1351_s4  ;;  %p1357_p12 = scmp.lt.s32.totalorder %s1351_s4, %s1351_s4 }
  0x53   :  { %1133 = vmatpush3.bf16.msra.mxu0 %v1285_v62 }
  0x54   :  { %1155 = vmatpush3.bf16.msra.mxu1 %v1286_v63  ;;  %1134 = vmatprep.subr.bf16.mxu0 %v1287_v0  ;;  %p1358_p13 = por %p1357_p12, %p1356_p11 }
  0x55   :  { %1156 = vmatprep.subr.bf16.mxu1 %v1288_v1 }
  0x56   :  { %p1359_p0 = pnand %p1358_p13, %p1352_p10 }
  0x57   :  { %1135 = vmatpush3.bf16.msra.mxu0 %v1289_v2 }
  0x58   :  { %1157 = vmatpush3.bf16.msra.mxu1 %v1290_v3  ;;  %1136 = vmatprep.subr.bf16.mxu0 %v1291_v4  ;;  %v1069_v4 = vld [vmem:[%s1514_s6] ss:$0 sm:$0xff] }
  0x59   :  { %1158 = vmatprep.subr.bf16.mxu1 %v1292_v5 }
  0x5b   :  { %1137 = vmatpush3.bf16.msra.mxu0 %v1293_v6 }
  0x5c   :  { %1159 = vmatpush3.bf16.msra.mxu1 %v1294_v7  ;;  %1184 = vmatprep.subr.bf16.mxu0 %v1381_v17 }
  0x5d   :  { %1204 = vmatprep.subr.bf16.mxu1 %v1381_v17 }
  0x5e   :  { %704 = vmatmul.mubr.bf16.vlgmr.msra.gmra.mxu0 %v68_v14 }
  0x5f   :  { %744 = vmatmul.mubr.bf16.vlgmr.msra.gmra.mxu1 %v70_v15  ;;  %1185 = vmatpush3.bf16.msra.mxu0 %v1295_v16 }
  0x60   :  { %1186 = vmatprep.subr.bf16.mxu0 %v1381_v17  ;;  %1200 = vmatprep.mubr.msk.bf16.mxu0 %vm1382_vm0, %v1381_v17 }
  0x61   :  { %1220 = vmatprep.mubr.msk.bf16.mxu1 %vm1382_vm0, %v1381_v17  ;;  %1205 = vmatpush3.bf16.msra.mxu1 %v1303_v25 }
  0x62   :  { %1206 = vmatprep.subr.bf16.mxu1 %v1381_v17 }
  0x63   :  { %1187 = vmatpush3.bf16.msra.mxu0 %v1296_v18 }
  0x64   :  { %1188 = vmatprep.subr.bf16.mxu0 %v1381_v17 }
  0x65   :  { %1207 = vmatpush3.bf16.msra.mxu1 %v1304_v26 }
  0x66   :  { %1208 = vmatprep.subr.bf16.mxu1 %v1381_v17 }
  0x67   :  { %1189 = vmatpush3.bf16.msra.mxu0 %v1297_v19 }
  0x68   :  { %1190 = vmatprep.subr.bf16.mxu0 %v1381_v17 }
  0x69   :  { %1209 = vmatpush3.bf16.msra.mxu1 %v1305_v27 }
  0x6a   :  { %1210 = vmatprep.subr.bf16.mxu1 %v1381_v17 }
  0x6b   :  { %1191 = vmatpush3.bf16.msra.mxu0 %v1298_v20 }
  0x6c   :  { %1192 = vmatprep.subr.bf16.mxu0 %v1381_v17 }
  0x6d   :  { %1211 = vmatpush3.bf16.msra.mxu1 %v1306_v28 }
  0x6e   :  { %1212 = vmatprep.subr.bf16.mxu1 %v1381_v17 }
  0x6f   :  { %1193 = vmatpush3.bf16.msra.mxu0 %v1299_v21 }
  0x70   :  { %1194 = vmatprep.subr.bf16.mxu0 %v1381_v17 }
  0x71   :  { %1213 = vmatpush3.bf16.msra.mxu1 %v1307_v29 }
  0x72   :  { %1214 = vmatprep.subr.bf16.mxu1 %v1381_v17 }
  0x73   :  { %1195 = vmatpush3.bf16.msra.mxu0 %v1300_v22 }
  0x74   :  { %1196 = vmatprep.subr.bf16.mxu0 %v1381_v17 }
  0x75   :  { %1215 = vmatpush3.bf16.msra.mxu1 %v1308_v30 }
  0x76   :  { %1216 = vmatprep.subr.bf16.mxu1 %v1381_v17 }
  0x77   :  { %1197 = vmatpush3.bf16.msra.mxu0 %v1301_v23 }
  0x78   :  { %1198 = vmatprep.subr.bf16.mxu0 %v1381_v17 }
  0x79   :  { %1217 = vmatpush3.bf16.msra.mxu1 %v1309_v58 }
  0x7a   :  { %1218 = vmatprep.subr.bf16.mxu1 %v1381_v17 }
  0x7b   :  { %1199 = vmatpush3.bf16.msra.mxu0 %v1302_v24 }
  0x7d   :  { %1219 = vmatpush3.bf16.msra.mxu1 %v1310_v59 }
  0xfe   :  { %v1094_v31 = vpop.f32.mrf.mxu0 }
  0xff   :  { %v1116_v32 = vpop.f32.mrf.mxu1 }
 0x100   :  { %v1095_v33 = vpop.f32.mrf.mxu0 }
 0x101   :  { %v1117_v34 = vpop.f32.mrf.mxu1  ;;  %v1096_v39 = vadd.f32 %v1095_v33, %v1094_v31 }
 0x102   :  { %v1097_v35 = vpop.f32.mrf.mxu0  ;;  %v1118_v42 = vadd.f32 %v1117_v34, %v1116_v32 }
 0x103   :  { %v1119_v36 = vpop.f32.mrf.mxu1  ;;  %v626_v41 = vadd.f32 %v1096_v39, %v995_v40 }
 0x104   :  { %v1098_v37 = vpop.f32.mrf.mxu0 }
 0x105   :  { %v1120_v38 = vpop.f32.mrf.mxu1  ;;  %v666_v46 = vadd.f32 %v1118_v42, %v626_v41 }
 0x11e   :  { %v1138_v43 = vpop.f32.mrf.mxu0 }
 0x11f   :  { %v1160_v44 = vpop.f32.mrf.mxu1 }
 0x120   :  { %v1139_v45 = vpop.f32.mrf.mxu0 }
 0x121   :  { %v1140_v47 = vadd.f32 %v1139_v45, %v1138_v43  ;;  %v1161_v48 = vpop.f32.mrf.mxu1 }
 0x122   :  { %v1141_v49 = vpop.f32.mrf.mxu0  ;;  %v1162_v51 = vadd.f32 %v1161_v48, %v1160_v44 }
 0x123   :  { %v706_v50 = vadd.f32 %v1140_v47, %v666_v46  ;;  %v1163_v52 = vpop.f32.mrf.mxu1 }
 0x124   :  { %v1142_v53 = vpop.f32.mrf.mxu0 }
 0x125   :  { %v746_v54 = vadd.f32 %v1162_v51, %v706_v50  ;;  %v1164_v55 = vpop.f32.mrf.mxu1 }
 0x127   :  { %v751_v56 = vmax.f32 %v746_v54, 0.0 }
 0x129   :  { %v752_v57 = vpack.c.bf16 %v751_v56, %v751_v56 }
 0x12b   :  { %1201 = vmatmul.mubr.bf16.vlgmr.msra.gmra.mxu0 %v752_v57 }
 0x1eb   :  { %v858_v61 = vpop.f32.mrf.mxu0 }
 0x1ec   :  { %v859_v62 = vadd.f32 %v1060_v60, %v858_v61 }
 0x1ed   :  { %v1202_v63 = vpop.f32.mrf.mxu0 }
 0x1ee   :  { %v864_v0 = vmax.f32 %v859_v62, 0.0 }
 0x1ef   :  { %v861_v1 = vpop.f32.mrf.mxu0 }
 0x1f0   :  { %v865_v2 = vpack.c.bf16 %v864_v0, %v864_v0 }
 0x1f1   :  { %v1203_v3 = vpop.f32.mrf.mxu0 }
 0x1f2   :  { %1221 = vmatmul.mubr.bf16.vlgmr.msra.gmra.mxu1 %v865_v2 }
 0x2b2   :  { %v971_v5 = vpop.f32.mrf.mxu1 }
 0x2b3   :  { %v972_v6 = vadd.f32 %v1069_v4, %v971_v5 }
 0x2b4   :  { %v1222_v7 = vpop.f32.mrf.mxu1 }
 0x2b5   :  { %978 = vst.msk [vmem:[#allocation7] sm:$0xff] %vm977_vm1, %v972_v6 }
 0x2b6   :  { %v974_v8 = vpop.f32.mrf.mxu1 }
 0x2b7   :  { %1362 = shalt.err (!%p1359_p0)
}
 0x2b8   :  { %988 = dma.vmem_to_hbm [thread:$0]  %s986_s23, 128, %s1515_s7, [#allocation4]   ;;  %v1223_v9 = vpop.f32.mrf.mxu1 }
 0x2b9   :  { %1375 = dma.done.wait [#allocation4], 128  }
 0x2ba   :  { %1376 = vsyncadd [#allocation4], 4294967168 }
 0x2bb   :  { %992 = vsyncpa [#allocation3], 1 }
 0x2bc   :  { %993 = vsyncpa [#allocation6], 1 }
 0x2bd   :  { %994 = vsyncpa [#allocation4], 1 }

</bundles_post_ra>
